<compile_context>
chip_gen: v7x
topology: tpu7x:2x2x1
jax: 0.10.0
libtpu: 0.0.40
codegen_flags: <defaults>
</compile_context>

<pallas_src>
import functools

import numpy as np
import jax
import jax.numpy as jnp
from jax.experimental import pallas as pl
from jax.experimental.pallas import tpu as pltpu

_NEG_INF = -1e30


def _round_up(x, m):
    return ((x + m - 1) // m) * m


def _cdiv(a, b):
    return (a + b - 1) // b


def _pick_tiling(rows, row_bytes):
    """Pick (tile_rows, num_tiles): large tiles, minimal row padding.

    Single-tile when the whole row axis fits a ~2 MiB budget (block dims equal
    to the full array dims need no (8,128) alignment and no pad copy);
    otherwise prefer an exact 8-row-aligned split to avoid an HBM pad pass.
    """
    budget = 2 * 1024 * 1024
    if rows * row_bytes <= budget:
        return rows, 1
    max_tile = max(8, min(1024, (budget // row_bytes) // 8 * 8))
    ntiles = _cdiv(rows, max_tile)
    for n in range(ntiles, ntiles + 8):
        if rows % n == 0 and (rows // n) % 8 == 0:
            return rows // n, n
    return _round_up(_cdiv(rows, ntiles), 8), ntiles


def _partials_kernel(logits_ref, out_ref, *,
                     num_classes, rows_total, q_per_batch, num_batches):
    """Per-tile partials, lane-dense (1, 1, 128):
       lanes 0..B-1 : per-batch count of rows whose argmax is a real class
       lane  B      : sum of per-row log-sum-exp
       lane  B+1    : sum of the no-object logit column
    """
    t = pl.program_id(0)
    x = logits_ref[...].astype(jnp.float32)            # (T, K), f32 in-register
    T, K = x.shape

    # global row ids of this tile + validity of padded tail rows
    riota = jax.lax.broadcasted_iota(jnp.int32, (T, 1), 0)
    grow = t * T + riota                                # (T, 1)
    valid = (grow < rows_total).astype(jnp.float32)     # (T, 1)

    # per-row log-sum-exp (f32)
    mx = jnp.max(x, axis=-1, keepdims=True)
    lse = mx + jnp.log(jnp.sum(jnp.exp(x - mx), axis=-1, keepdims=True))   # (T, 1)

    kiota = jax.lax.broadcasted_iota(jnp.int32, (T, K), 1)
    noobj = jnp.sum(jnp.where(kiota == num_classes, x, 0.0),
                    axis=-1, keepdims=True)             # (T, 1)

    # cardinality indicator: torch.argmax(-1) != last class
    #   <=> max over real classes >= no-object logit (first-index tie break).
    best_real = jnp.max(jnp.where(kiota < num_classes, x, _NEG_INF),
                        axis=-1, keepdims=True)
    ind = (best_real >= noobj).astype(jnp.float32) * valid      # (T, 1)

    # scatter: lane b holds rows with b*Q <= global_row < (b+1)*Q (no int div)
    lane = jax.lax.broadcasted_iota(jnp.int32, (T, 128), 1)
    lane_lo = lane * q_per_batch
    in_batch = jnp.logical_and(grow >= lane_lo, grow < lane_lo + q_per_batch)
    contrib = jnp.where(in_batch, ind, 0.0)
    contrib = contrib + jnp.where(lane == num_batches, lse * valid, 0.0)
    contrib = contrib + jnp.where(lane == num_batches + 1, noobj * valid, 0.0)

    out_ref[...] = jnp.sum(contrib, axis=0, keepdims=True).reshape(1, 1, 128)


@functools.partial(jax.jit, static_argnames=("num_classes", "eos_coef"))
def _criterion_device(logits, cds, flat_idx, m_labels, tgt_cds, tgt_lens,
                      num_points, *, num_classes, eos_coef):
    B, Q, K = logits.shape
    P = cds.shape[-1]
    rows = B * Q

    logits2 = logits.reshape(rows, K)
    tile, ntiles = _pick_tiling(rows, K * logits.dtype.itemsize)
    rows_pad = tile * ntiles
    lp = logits2 if rows_pad == rows else jnp.pad(logits2, ((0, rows_pad - rows), (0, 0)))

    kernel = functools.partial(_partials_kernel,
                               num_classes=num_classes,
                               rows_total=rows,
                               q_per_batch=Q,
                               num_batches=B)

    partials = pl.pallas_call(
        kernel,
        out_shape=jax.ShapeDtypeStruct((ntiles, 1, 128), jnp.float32),
        grid=(ntiles,),
        in_specs=[pl.BlockSpec((tile, K), lambda t: (t, 0))],
        out_specs=pl.BlockSpec((1, 1, 128), lambda t: (t, 0, 0)),
        compiler_params=pltpu.CompilerParams(
            dimension_semantics=("parallel",)),   # no cross-step state -> v7x megacore OK
        cost_estimate=pl.CostEstimate(
            flops=8 * rows_pad * K,
            transcendentals=rows_pad * (K + 1),
            bytes_accessed=rows_pad * K * lp.dtype.itemsize + ntiles * 128 * 4),
    )(lp)

    psum = jnp.sum(partials, axis=(0, 1))                       # (128,)
    card_counts = psum[:B]                                      # per-batch object counts
    lse_sum = psum[B]                                           # sum_q lse_q (all real rows)
    noobj_sum = psum[B + 1]                                     # sum_q logits[q, no-object]

    # ---- tiny matched-pair corrections in plain XLA (O(M*K)) ----
    m_logits = jnp.take(logits2.astype(jnp.float32), flat_idx, axis=0)    # (M_pad, K)
    m_cds = jnp.take(cds.reshape(rows, P).astype(jnp.float32), flat_idx, axis=0)
    m_valid = (m_labels >= 0)
    vf = m_valid.astype(jnp.float32)
    n_match = jnp.sum(vf)
    labels_safe = jnp.maximum(m_labels, 0)

    mxm = jnp.max(m_logits, axis=-1, keepdims=True)
    lse_m = (mxm + jnp.log(jnp.sum(jnp.exp(m_logits - mxm), axis=-1, keepdims=True)))[:, 0]
    tgt_logit = jnp.take_along_axis(m_logits, labels_safe[:, None], axis=-1)[:, 0]
    noobj_m = m_logits[:, num_classes]

    # weighted cross entropy (exact torch.nn.functional.cross_entropy with class weights)
    ce_corr = jnp.sum(vf * ((lse_m - tgt_logit) - eos_coef * (lse_m - noobj_m)))
    ce_num = eos_coef * (lse_sum - noobj_sum) + ce_corr
    ce_den = eos_coef * (float(rows) - n_match) + n_match
    loss_ce = ce_num / jnp.maximum(ce_den, 1e-12)

    # class error on matched predictions (torch argmax = first-index tie break)
    pred = jnp.argmax(m_logits, axis=-1)
    n_correct = jnp.sum(vf * (pred == m_labels).astype(jnp.float32))
    class_error = 100.0 - 100.0 * n_correct / jnp.maximum(n_match, 1.0)

    # cardinality error
    cardinality_error = jnp.mean(jnp.abs(card_counts - tgt_lens))

    # center-degree L1 loss
    loss_cd = jnp.sum(vf[:, None] * jnp.abs(m_cds - tgt_cds)) / num_points

    return loss_ce, class_error, cardinality_error, loss_cd


def simple_matcher(outputs, targets):
    # TODO(synk): Hungarian matching (scipy.optimize.linear_sum_assignment) has no
    # clean Pallas equivalent; use a deterministic identity matching instead.
    return [(np.arange(len(t['classes'])), np.arange(len(t['classes']))) for t in targets]


class SetCriterion:
    """JAX/Pallas re-implementation of the DETR SetCriterion forward pass."""

    def __init__(self, num_classes, matcher, weight_dict, eos_coef, losses):
        self.num_classes = num_classes
        self.matcher = matcher
        self.weight_dict = weight_dict
        self.eos_coef = float(eos_coef)
        self.losses = losses

    def forward(self, outputs, targets):
        outputs_without_aux = {k: v for k, v in outputs.items() if k != 'aux_outputs'}
        indices = self.matcher(outputs_without_aux, targets)

        logits = outputs['outputs_class']                    # (B, Q, K), stays on device
        cds = outputs['output_center_degree_points']         # (B, Q, P), stays on device
        B, Q, K = logits.shape
        P = cds.shape[-1]
        assert K == self.num_classes + 1
        if B + 2 > 128:
            raise ValueError("batch size must be <= 126 for the lane-packed partial output")

        # ---- ragged glue: tiny host-side index/label preparation only ----
        src_idx = [np.asarray(s, np.int64).reshape(-1) for s, _ in indices]
        tgt_idx = [np.asarray(t, np.int64).reshape(-1) for _, t in indices]
        n_match = int(sum(len(s) for s in src_idx))
        M_pad = max(8, _round_up(max(n_match, 1), 8))

        flat_idx = np.zeros((M_pad,), np.int32)              # flattened (b*Q + q) indices
        m_labels = np.full((M_pad,), -1, np.int32)            # -1 marks padded slots
        tgt_cds = np.zeros((M_pad, P), np.float32)
        off = 0
        for b, (s, t, tgt) in enumerate(zip(src_idx, tgt_idx, targets)):
            n = len(s)
            if n == 0:
                continue
            flat_idx[off:off + n] = (b * Q + s).astype(np.int32)
            m_labels[off:off + n] = np.asarray(tgt['classes'], np.int64)[t].astype(np.int32)
            tgt_cds[off:off + n] = np.asarray(tgt['data'], np.float32).reshape(-1, P)[t]
            off += n

        tgt_lens = np.asarray([len(t['classes']) for t in targets], np.float32)
        num_points = np.float32(max(float(tgt_lens.sum()), 1.0))
        # TODO(synk): distributed all_reduce of num_points / get_world_size not implemented.

        loss_ce, class_error, card_err, loss_cd = _criterion_device(
            jnp.asarray(logits), jnp.asarray(cds),
            jnp.asarray(flat_idx), jnp.asarray(m_labels), jnp.asarray(tgt_cds),
            jnp.asarray(tgt_lens), jnp.asarray(num_points),
            num_classes=self.num_classes, eos_coef=self.eos_coef)

        losses = {}
        if 'labels' in self.losses:
            losses['loss_ce'] = loss_ce
            losses['class_error'] = class_error
        if 'cardinality' in self.losses:
            losses['cardinality_error'] = card_err
        if 'center_degree' in self.losses:
            losses['loss_cd'] = loss_cd
        # TODO(synk): 'masks' loss and 'aux_outputs' re-matching are not implemented
        # (the PyTorch masks loss needs nested tensors + bilinear interpolate).
        return losses

    __call__ = forward


if __name__ == "__main__":
    B, Q, NUM_CLASSES, P = 2, 8, 4, 4
    K = NUM_CLASSES + 1

    key = jax.random.PRNGKey(0)
    k1, k2, k3 = jax.random.split(key, 3)
    logits = jax.random.normal(k1, (B, Q, K), jnp.float32)
    cds = jax.random.uniform(k2, (B, Q, P), jnp.float32)
    outputs = {'outputs_class': logits, 'output_center_degree_points': cds}

    n_tgts = [3, 2]
    tkeys = jax.random.split(k3, 2 * B)
    targets = []
    for i, n in enumerate(n_tgts):
        classes = jax.random.randint(tkeys[2 * i], (n,), 0, NUM_CLASSES)
        data = jax.random.uniform(tkeys[2 * i + 1], (n, P), jnp.float32)
        targets.append({'classes': np.asarray(classes), 'data': np.asarray(data)})

    criterion = SetCriterion(
        num_classes=NUM_CLASSES,
        matcher=simple_matcher,
        weight_dict={'loss_ce': 1.0, 'loss_cd': 1.0},
        eos_coef=0.1,
        losses=['labels', 'cardinality', 'center_degree'],
    )

    losses = criterion(outputs, targets)
    jax.block_until_ready(losses)
    print("KERNEL_OK")
</pallas_src>

<mosaic_0001>
module attributes {stable_mosaic.version = 11 : i64} {
  func.func @_partials_kernel(%arg0: i32, %arg1: memref<16x5xf32, #tpu.memory_space<vmem>>, %arg2: memref<1x1x128xf32, #tpu.memory_space<vmem>>) attributes {dimension_semantics = [#tpu.dimension_semantics<parallel>], iteration_bounds = array<i64: 1>, scalar_prefetch = 0 : i64, scratch_operands = 0 : i64, tpu.core_type = #tpu.core_type<tc>, window_params = [{transform_indices = @transform_0, window_bounds = array<i64: 16, 5>}, {transform_indices = @transform_1, window_bounds = array<i64: 1, 1, 128>}]} {
    %c0 = arith.constant 0 : index
    %c0_0 = arith.constant 0 : index
    %0 = vector.load %arg1[%c0, %c0_0] : memref<16x5xf32, #tpu.memory_space<vmem>>, vector<16x5xf32>
    %1 = tpu.iota {dimensions = array<i32: 0>} : vector<16x1xi32>
    %c16_i32 = arith.constant 16 : i32
    %2 = arith.muli %arg0, %c16_i32 : i32
    %3 = vector.broadcast %2 : i32 to vector<16x1xi32>
    %4 = arith.addi %3, %1 : vector<16x1xi32>
    %c16_i32_1 = arith.constant 16 : i32
    %5 = vector.broadcast %c16_i32_1 : i32 to vector<16x1xi32>
    %6 = arith.cmpi slt, %4, %5 : vector<16x1xi32>
    %7 = arith.extui %6 : vector<16x1xi1> to vector<16x1xi32>
    %8 = arith.sitofp %7 : vector<16x1xi32> to vector<16x1xf32>
    %cst = arith.constant dense<0xFF800000> : vector<16xf32>
    %9 = vector.multi_reduction <maximumf>, %0, %cst [1] : vector<16x5xf32> to vector<16xf32>
    %10 = vector.shape_cast %9 : vector<16xf32> to vector<16x1xf32>
    %11 = vector.broadcast %10 : vector<16x1xf32> to vector<16x5xf32>
    %12 = arith.subf %0, %11 : vector<16x5xf32>
    %13 = math.exp %12 : vector<16x5xf32>
    %cst_2 = arith.constant dense<0.000000e+00> : vector<16xf32>
    %14 = vector.multi_reduction <add>, %13, %cst_2 [1] : vector<16x5xf32> to vector<16xf32>
    %15 = vector.shape_cast %14 : vector<16xf32> to vector<16x1xf32>
    %16 = math.log %15 : vector<16x1xf32>
    %17 = arith.addf %10, %16 : vector<16x1xf32>
    %18 = tpu.iota {dimensions = array<i32: 1>} : vector<16x5xi32>
    %c4_i32 = arith.constant 4 : i32
    %19 = vector.broadcast %c4_i32 : i32 to vector<16x5xi32>
    %20 = arith.cmpi eq, %18, %19 : vector<16x5xi32>
    %cst_3 = arith.constant 0.000000e+00 : f32
    %21 = vector.broadcast %cst_3 : f32 to vector<16x5xf32>
    %22 = arith.select %20, %0, %21 : vector<16x5xi1>, vector<16x5xf32>
    %cst_4 = arith.constant dense<0.000000e+00> : vector<16xf32>
    %23 = vector.multi_reduction <add>, %22, %cst_4 [1] : vector<16x5xf32> to vector<16xf32>
    %24 = vector.shape_cast %23 : vector<16xf32> to vector<16x1xf32>
    %c4_i32_5 = arith.constant 4 : i32
    %25 = vector.broadcast %c4_i32_5 : i32 to vector<16x5xi32>
    %26 = arith.cmpi slt, %18, %25 : vector<16x5xi32>
    %cst_6 = arith.constant -1.000000e+30 : f32
    %27 = vector.broadcast %cst_6 : f32 to vector<16x5xf32>
    %28 = arith.select %26, %0, %27 : vector<16x5xi1>, vector<16x5xf32>
    %cst_7 = arith.constant dense<0xFF800000> : vector<16xf32>
    %29 = vector.multi_reduction <maximumf>, %28, %cst_7 [1] : vector<16x5xf32> to vector<16xf32>
    %30 = vector.shape_cast %29 : vector<16xf32> to vector<16x1xf32>
    %31 = arith.cmpf oge, %30, %24 : vector<16x1xf32>
    %32 = arith.extui %31 : vector<16x1xi1> to vector<16x1xi32>
    %33 = arith.sitofp %32 : vector<16x1xi32> to vector<16x1xf32>
    %34 = arith.mulf %33, %8 : vector<16x1xf32>
    %35 = tpu.iota {dimensions = array<i32: 1>} : vector<16x128xi32>
    %c8_i32 = arith.constant 8 : i32
    %36 = vector.broadcast %c8_i32 : i32 to vector<16x128xi32>
    %37 = arith.muli %35, %36 : vector<16x128xi32>
    %38 = vector.broadcast %4 : vector<16x1xi32> to vector<16x128xi32>
    %39 = arith.cmpi sge, %38, %37 : vector<16x128xi32>
    %c8_i32_8 = arith.constant 8 : i32
    %40 = vector.broadcast %c8_i32_8 : i32 to vector<16x128xi32>
    %41 = arith.addi %37, %40 : vector<16x128xi32>
    %42 = vector.broadcast %4 : vector<16x1xi32> to vector<16x128xi32>
    %43 = arith.cmpi slt, %42, %41 : vector<16x128xi32>
    %44 = arith.andi %39, %43 : vector<16x128xi1>
    %cst_9 = arith.constant 0.000000e+00 : f32
    %45 = vector.shape_cast %34 : vector<16x1xf32> to vector<16x1xf32>
    %46 = vector.broadcast %45 : vector<16x1xf32> to vector<16x128xf32>
    %47 = vector.broadcast %cst_9 : f32 to vector<16x128xf32>
    %48 = arith.select %44, %46, %47 : vector<16x128xi1>, vector<16x128xf32>
    %c2_i32 = arith.constant 2 : i32
    %49 = vector.broadcast %c2_i32 : i32 to vector<16x128xi32>
    %50 = arith.cmpi eq, %35, %49 : vector<16x128xi32>
    %51 = arith.mulf %17, %8 : vector<16x1xf32>
    %cst_10 = arith.constant 0.000000e+00 : f32
    %52 = vector.shape_cast %51 : vector<16x1xf32> to vector<16x1xf32>
    %53 = vector.broadcast %52 : vector<16x1xf32> to vector<16x128xf32>
    %54 = vector.broadcast %cst_10 : f32 to vector<16x128xf32>
    %55 = arith.select %50, %53, %54 : vector<16x128xi1>, vector<16x128xf32>
    %56 = arith.addf %48, %55 : vector<16x128xf32>
    %c3_i32 = arith.constant 3 : i32
    %57 = vector.broadcast %c3_i32 : i32 to vector<16x128xi32>
    %58 = arith.cmpi eq, %35, %57 : vector<16x128xi32>
    %59 = arith.mulf %24, %8 : vector<16x1xf32>
    %cst_11 = arith.constant 0.000000e+00 : f32
    %60 = vector.shape_cast %59 : vector<16x1xf32> to vector<16x1xf32>
    %61 = vector.broadcast %60 : vector<16x1xf32> to vector<16x128xf32>
    %62 = vector.broadcast %cst_11 : f32 to vector<16x128xf32>
    %63 = arith.select %58, %61, %62 : vector<16x128xi1>, vector<16x128xf32>
    %64 = arith.addf %56, %63 : vector<16x128xf32>
    %cst_12 = arith.constant dense<0.000000e+00> : vector<128xf32>
    %65 = vector.multi_reduction <add>, %64, %cst_12 [0] : vector<16x128xf32> to vector<128xf32>
    %66 = vector.shape_cast %65 : vector<128xf32> to vector<1x128xf32>
    %67 = vector.shape_cast %66 : vector<1x128xf32> to vector<1x1x128xf32>
    %c0_13 = arith.constant 0 : index
    %c0_14 = arith.constant 0 : index
    %c0_15 = arith.constant 0 : index
    %68 = vector.load %arg2[%c0_13, %c0_14, %c0_15] : memref<1x1x128xf32, #tpu.memory_space<vmem>>, vector<1x1x128xf32>
    tpu.vector_store %arg2[%c0_13, %c0_14, %c0_15], %67 {strides = array<i32>} : memref<1x1x128xf32, #tpu.memory_space<vmem>>, vector<1x1x128xf32>,
    return
  }
  func.func @transform_0(%arg0: i32) -> (i32, i32) {
    %c0_i32 = arith.constant 0 : i32
    %c0_i32_0 = arith.constant 0 : i32
    return %arg0, %c0_i32 : i32, i32
  }
  func.func @transform_1(%arg0: i32) -> (i32, i32, i32) {
    %c0_i32 = arith.constant 0 : i32
    %c0_i32_0 = arith.constant 0 : i32
    %c0_i32_1 = arith.constant 0 : i32
    return %arg0, %c0_i32, %c0_i32_0 : i32, i32, i32
  }
}

</mosaic_0001>

<bundles_post_ra>
// kernel: _criterion_device.1
= control target key start
LH: loop header
LB: loop body
LE: loop exit
PB: predicated region body
PF: predicated region fallthrough
CT: control target
= control target key end

     0   :  { %vm23_vm0 = vcmask 39936   ;;  %v10_v4 = vlaneseq  ;;  %v123_v36 = vmov 0.0   ;;  %s170_s0 = inlined_call_operand.vmem [shape: f32[16,5], index: 0, kind: input, shape index: {}]   ;;  %s171_s1 = inlined_call_operand.vmem [shape: f32[1,1,128], index: 1, kind: output, shape index: {}]  }
   0x1   :  { %v8_v0 = vld [vmem:[%s170_s0] sm:$0xff]  ;;  %v9_v1 = vld [vmem:[%s170_s0 + $0x8] sm:$0xff] }
   0x2   :  { %v24_v2 = vsel %vm23_vm0, %v8_v0, -inf  ;;  %v27_v3 = vsel %vm23_vm0, %v9_v1, -inf  ;;  %v142_v5 = vand.u32 127, %v10_v4  ;;  %v11_v28 = vshrl.u32 %v10_v4, 7 }
   0x3   :  { %25 = vmax.xlane.f32.xlu0 %v24_v2 }
   0x4   :  { %vm50_vm1 = vcmp.eq.s32.totalorder %v142_v5, 4  ;;  %vm59_vm2 = vcmp.lt.s32.totalorder %v142_v5, 4  ;;  %v76_v26 = vmul.u32 8, %v142_v5  ;;  %v12_v32 = vadd.s32 8, %v11_v28 }
   0x5   :  { %v51_v6 = vsel %vm50_vm1, %v8_v0, 0.0  ;;  %v60_v8 = vsel %vm59_vm2, %v8_v0, -1e+30  ;;  %v52_v19 = vsel %vm50_vm1, %v9_v1, 0.0  ;;  %v61_v22 = vsel %vm59_vm2, %v9_v1, -1e+30 }
   0x6   :  { %v53_v7 = vsel %vm23_vm0, %v51_v6, 0.0  ;;  %v62_v9 = vsel %vm23_vm0, %v60_v8, -inf  ;;  %v56_v21 = vsel %vm23_vm0, %v52_v19, 0.0  ;;  %v65_v23 = vsel %vm23_vm0, %v61_v22, -inf }
   0x7   :  { %28 = vmax.xlane.f32.xlu0 %v27_v3  ;;  %v79_v29 = vadd.s32 8, %v76_v26  ;;  %vm77_vm3 = vcmp.ge.s32.totalorder %v11_v28, %v76_v26  ;;  %vm86_vm6 = vcmp.eq.s32.totalorder %v142_v5, 2  ;;  %vm78_vm8 = vcmp.ge.s32.totalorder %v12_v32, %v76_v26 }
   0x8   :  { %vm93_vm12 = vcmp.eq.s32.totalorder %v142_v5, 3 }
   0x9   :  { %vm80_vm4 = vcmp.lt.s32.totalorder %v11_v28, %v79_v29  ;;  %vm81_vm9 = vcmp.lt.s32.totalorder %v12_v32, %v79_v29 }
   0xa   :  { %vm82_vm7 = vmand %vm77_vm3, %vm80_vm4 }
   0xb   :  { %54 = vadd.xlane.f32.xlu0 %v53_v7  ;;  %vm83_vm11 = vmand %vm78_vm8, %vm81_vm9 }
   0xf   :  { %63 = vmax.xlane.f32.xlu0 %v62_v9 }
  0x90   :  { %v26_v10 = vpop.xlane.xlu0 %25 }
  0x91   :  { %v30_v11 = vsub.f32 %v8_v0, %v26_v10 }
  0x93   :  { %v32_v12 = vmul.f32 1.442695, %v30_v11 }
  0x94   :  { %v29_v13 = vpop.xlane.xlu0 %28 }
  0x95   :  { %115 = vpow2.f32 %v32_v12  ;;  %v31_v14 = vsub.f32 %v9_v1, %v29_v13 }
  0x97   :  { %v34_v15 = vmul.f32 1.442695, %v31_v14 }
  0x98   :  { %v55_v25 = vpop.xlane.xlu0 %54 }
  0x99   :  { %117 = vpow2.f32 %v34_v15  ;;  %v96_v50 = vsel %vm93_vm12, %v55_v25, 0.0 }
  0x9c   :  { %v64_v30 = vpop.xlane.xlu0 %63 }
  0x9d   :  { %vm68_vm5 = vcmp.ge.f32.partialorder %v64_v30, %v55_v25 }
  0x9e   :  { %v112_v37 = vsel %vm68_vm5, 1.0, %v123_v36 }
  0x9f   :  { %v116_v16 = vpop.eup %115  ;;  %v84_v42 = vsel %vm82_vm7, %v112_v37, 0.0 }
  0xa0   :  { %v36_v17 = vsel %vm23_vm0, %v116_v16, 0.0 }
  0xa1   :  { %37 = vadd.xlane.f32.xlu1 %v36_v17 }
  0xa3   :  { %v118_v18 = vpop.eup %117 }
  0xa4   :  { %v39_v20 = vsel %vm23_vm0, %v118_v18, 0.0 }
  0xa5   :  { %40 = vadd.xlane.f32.xlu1 %v39_v20 }
  0xa9   :  { %57 = vadd.xlane.f32.xlu1 %v56_v21 }
  0xad   :  { %66 = vmax.xlane.f32.xlu1 %v65_v23 }
 0x12e   :  { %v38_v24 = vpop.xlane.xlu1 %37 }
 0x12f   :  { %119 = vlog2.f32 %v38_v24 }
 0x132   :  { %v41_v27 = vpop.xlane.xlu1 %40 }
 0x133   :  { %121 = vlog2.f32 %v41_v27 }
 0x136   :  { %v58_v31 = vpop.xlane.xlu1 %57 }
 0x137   :  { %v97_v49 = vsel %vm93_vm12, %v58_v31, 0.0 }
 0x139   :  { %v120_v33 = vpop.eup %119 }
 0x13a   :  { %v43_v34 = vmul.f32 0.6931472, %v120_v33  ;;  %v67_v35 = vpop.xlane.xlu1 %66 }
 0x13b   :  { %vm69_vm10 = vcmp.ge.f32.partialorder %v67_v35, %v58_v31 }
 0x13c   :  { %v46_v38 = vadd.f32 %v43_v34, %v26_v10  ;;  %v113_v43 = vsel %vm69_vm10, 1.0, %v123_v36 }
 0x13d   :  { %v122_v39 = vpop.eup %121  ;;  %v85_v47 = vsel %vm83_vm11, %v113_v43, 0.0 }
 0x13e   :  { %v45_v40 = vmul.f32 0.6931472, %v122_v39  ;;  %v89_v41 = vsel %vm86_vm6, %v46_v38, 0.0 }
 0x13f   :  { %v91_v45 = vadd.f32 %v89_v41, %v84_v42 }
 0x140   :  { %v47_v44 = vadd.f32 %v45_v40, %v29_v13 }
 0x141   :  { %v98_v52 = vadd.f32 %v96_v50, %v91_v45 }
 0x142   :  { %v90_v46 = vsel %vm86_vm6, %v47_v44, 0.0 }
 0x143   :  { %v92_v48 = vadd.f32 %v90_v46, %v85_v47 }
 0x145   :  { %v99_v51 = vadd.f32 %v97_v49, %v92_v48 }
 0x147   :  { %v100_v53 = vadd.f32 %v99_v51, %v98_v52 }
 0x149   :  { %v101_v54 = vrot.slane %v100_v53, 4 }
 0x14b   :  { %v102_v55 = vadd.f32 %v101_v54, %v100_v53 }
 0x14d   :  { %v103_v56 = vrot.slane %v102_v55, 2 }
 0x14f   :  { %v104_v57 = vadd.f32 %v103_v56, %v102_v55 }
 0x151   :  { %v105_v58 = vrot.slane %v104_v57, 1 }
 0x153   :  { %v106_v59 = vadd.f32 %v105_v58, %v104_v57 }
 0x155   :  { %107 = vst [vmem:[%s171_s1] sm:$0x1] %v106_v59 }

</bundles_post_ra>
